<compile_context>
chip_gen: v6e
topology: v6e:2x2x1
jax: 0.10.0
libtpu: 0.0.40
codegen_flags: <defaults>
</compile_context>

<pallas_src>
import jax
import jax.numpy as jnp
from jax import lax
from jax.experimental import pallas as pl
from jax.experimental.pallas import tpu as pltpu

EPS = 1e-5
ROW_TILE_TARGET = 512        # sweep {512, 1024} per generation (mem-bound passes)


def _vmem_limit_bytes():
    """Generation-aware scoped-VMEM limit (v5e/v6e: 128 MiB phys, v7x: 64 MiB)."""
    try:
        cap = pltpu.get_tpu_info().vmem_capacity_bytes
        return max(32 << 20, min(int(cap * 0.65), 96 << 20))
    except Exception:
        return 32 << 20


VMEM_LIMIT_BYTES = _vmem_limit_bytes()


def _compiler_params(n_parallel_axes):
    return pltpu.CompilerParams(
        dimension_semantics=("parallel",) * n_parallel_axes,
        vmem_limit_bytes=VMEM_LIMIT_BYTES,
    )


def _row_tile(rows, target=ROW_TILE_TARGET):
    """Largest multiple-of-8 divisor of `rows` that is <= target, preferring >=2
    grid steps (keeps both v7x TensorCores busy).  Falls back to `rows` for
    awkward shapes (no smaller multiple-of-8 divisor)."""
    best = None
    t = 8
    limit = min(target, rows - 1)
    while t <= limit:
        if rows % t == 0:
            best = t
        t += 8
    return best if best is not None else rows


# ----------------------------------------------------------------------------
# Pallas kernels
# ----------------------------------------------------------------------------
def _make_fused1x1_kernel(splits):
    """Fused 1x1 convs sharing one input: one MXU matmul, per-branch bf16 stores
    plus f32 BatchNorm partial sums / sums-of-squares for the whole fused width."""
    def kernel(x_ref, w_ref, *out_refs):
        y_refs = out_refs[:-1]
        s_ref = out_refs[-1]
        acc = jnp.dot(x_ref[...], w_ref[...], preferred_element_type=jnp.float32)
        off = 0
        for y_ref, c in zip(y_refs, splits):
            y_ref[...] = acc[:, off:off + c].astype(y_ref.dtype)
            off += c
        s_ref[0, 0:1, :] = jnp.sum(acc, axis=0, keepdims=True)
        s_ref[0, 1:2, :] = jnp.sum(acc * acc, axis=0, keepdims=True)
    return kernel


def _make_convkk_kernel(K, H, W, cin, cout):
    """KxK conv (stride 1, 'same' pad) with the reduce branch's BN+ReLU and the
    zero padding fused in-kernel; kw taps folded into the contraction."""
    P = (K - 1) // 2

    def kernel(yred_ref, w_ref, scale_ref, shift_ref, y_ref, s_ref, xpad_ref):
        # 1) activated, zero-padded input built in VMEM (never written to HBM).
        a = jnp.maximum(
            yred_ref[0].astype(jnp.float32) * scale_ref[0] + shift_ref[0], 0.0)
        xpad_ref[...] = jnp.zeros(xpad_ref.shape, xpad_ref.dtype)
        xpad_ref[P:P + H, P:P + W, :] = a.astype(xpad_ref.dtype)

        # 2) one matmul per kh (Python-unrolled): M = H*W, contraction = K*cin
        #    (im2col along W built in VMEM by concatenating K shifted slices).
        acc = jnp.zeros((H * W, cout), jnp.float32)
        for kh in range(K):
            slab = xpad_ref[kh:kh + H, :, :]                          # (H, W+2P, cin)
            cols = jnp.concatenate(
                [slab[:, kw:kw + W, :] for kw in range(K)], axis=-1)  # (H, W, K*cin)
            acc = acc + jnp.dot(cols.reshape(H * W, K * cin), w_ref[kh],
                                preferred_element_type=jnp.float32)
        y_ref[0] = acc.astype(y_ref.dtype)
        s_ref[0, 0:1, :] = jnp.sum(acc, axis=0, keepdims=True)
        s_ref[0, 1:2, :] = jnp.sum(acc * acc, axis=0, keepdims=True)

    return kernel


def _make_pool_conv1x1_kernel(H, W, cin):
    """Separable 3x3/stride-1/pad-1 max pool (bf16, in-VMEM border handling)
    fused with branch4's 1x1 conv matmul; pooled tensor never touches HBM."""
    def kernel(x_ref, w_ref, y_ref, s_ref, pad_ref):
        pad_ref[...] = jnp.full(pad_ref.shape, jnp.finfo(pad_ref.dtype).min,
                                pad_ref.dtype)
        pad_ref[1:1 + H, 1:1 + W, :] = x_ref[0]
        xp = pad_ref[...]
        rowmax = jnp.maximum(jnp.maximum(xp[:, 0:W, :], xp[:, 1:W + 1, :]),
                             xp[:, 2:W + 2, :])                      # (H+2, W, cin)
        pooled = jnp.maximum(jnp.maximum(rowmax[0:H], rowmax[1:H + 1]),
                             rowmax[2:H + 2])                        # (H, W, cin)
        y = jnp.dot(pooled.reshape(H * W, cin), w_ref[...],
                    preferred_element_type=jnp.float32)
        y_ref[0] = y.astype(y_ref.dtype)
        s_ref[0, 0:1, :] = jnp.sum(y, axis=0, keepdims=True)
        s_ref[0, 1:2, :] = jnp.sum(y * y, axis=0, keepdims=True)
    return kernel


def _finalize_kernel(y1_ref, y2_ref, y3_ref, y4_ref, scale_ref, shift_ref, o_ref):
    """Fused BN+ReLU + channel concat of all four branches (lane-dense store)."""
    y = jnp.concatenate(
        [y1_ref[...], y2_ref[...], y3_ref[...], y4_ref[...]],
        axis=-1).astype(jnp.float32)
    o_ref[...] = jnp.maximum(y * scale_ref[...] + shift_ref[...], 0.0)


# ----------------------------------------------------------------------------
# pallas_call wrappers
# ----------------------------------------------------------------------------
def _fused_conv1x1(x2d, wmat, splits):
    R, cin = x2d.shape
    ctot = wmat.shape[1]
    tile = _row_tile(R)
    ntiles = R // tile
    cost = pl.CostEstimate(
        flops=2 * R * cin * ctot, transcendentals=0,
        bytes_accessed=R * cin * 2 + cin * ctot * 2 + R * ctot * 2
        + ntiles * 2 * ctot * 4)
    out_shapes = tuple(jax.ShapeDtypeStruct((R, c), jnp.bfloat16) for c in splits) \
        + (jax.ShapeDtypeStruct((ntiles, 2, ctot), jnp.float32),)
    out_specs = tuple(pl.BlockSpec((tile, c), lambda i: (i, 0)) for c in splits) \
        + (pl.BlockSpec((1, 2, ctot), lambda i: (i, 0, 0)),)
    outs = pl.pallas_call(
        _make_fused1x1_kernel(splits),
        out_shape=out_shapes,
        grid=(ntiles,),
        in_specs=[pl.BlockSpec((tile, cin), lambda i: (i, 0)),
                  pl.BlockSpec((cin, ctot), lambda i: (0, 0))],
        out_specs=out_specs,
        compiler_params=_compiler_params(1),
        cost_estimate=cost,
    )(x2d, wmat)
    return outs[:-1], jnp.sum(outs[-1], axis=0)


def _convkk(yred_nhwc, wmat, scale, shift, K, H, W):
    # TODO(synk): for very large H*W on v7x (64 MiB VMEM), add a row-tiled grid
    # axis with a K-1 halo instead of one full image per grid step.
    N, _, _, cin = yred_nhwc.shape
    cout = wmat.shape[-1]
    P = (K - 1) // 2
    cost = pl.CostEstimate(
        flops=2 * N * H * W * K * K * cin * cout, transcendentals=0,
        bytes_accessed=(N * H * W * cin * 2 + K * K * cin * cout * 2
                        + N * H * W * cout * 2 + N * 2 * cout * 4))
    y, stats = pl.pallas_call(
        _make_convkk_kernel(K, H, W, cin, cout),
        out_shape=(jax.ShapeDtypeStruct((N, H * W, cout), jnp.bfloat16),
                   jax.ShapeDtypeStruct((N, 2, cout), jnp.float32)),
        grid=(N,),
        in_specs=[pl.BlockSpec((1, H, W, cin), lambda n: (n, 0, 0, 0)),
                  pl.BlockSpec((K, K * cin, cout), lambda n: (0, 0, 0)),
                  pl.BlockSpec((1, cin), lambda n: (0, 0)),
                  pl.BlockSpec((1, cin), lambda n: (0, 0))],
        out_specs=(pl.BlockSpec((1, H * W, cout), lambda n: (n, 0, 0)),
                   pl.BlockSpec((1, 2, cout), lambda n: (n, 0, 0))),
        scratch_shapes=[pltpu.VMEM((H + 2 * P, W + 2 * P, cin), jnp.bfloat16)],
        compiler_params=_compiler_params(1),
        cost_estimate=cost,
    )(yred_nhwc, wmat, scale, shift)
    return y.reshape(N * H * W, cout), jnp.sum(stats, axis=0)


def _pool_conv1x1(x_nhwc_bf16, wmat):
    N, H, W, cin = x_nhwc_bf16.shape
    cout = wmat.shape[1]
    cost = pl.CostEstimate(
        flops=2 * N * H * W * cin * cout, transcendentals=0,
        bytes_accessed=(N * H * W * cin * 2 + cin * cout * 2
                        + N * H * W * cout * 2 + N * 2 * cout * 4))
    y, stats = pl.pallas_call(
        _make_pool_conv1x1_kernel(H, W, cin),
        out_shape=(jax.ShapeDtypeStruct((N, H * W, cout), jnp.bfloat16),
                   jax.ShapeDtypeStruct((N, 2, cout), jnp.float32)),
        grid=(N,),
        in_specs=[pl.BlockSpec((1, H, W, cin), lambda n: (n, 0, 0, 0)),
                  pl.BlockSpec((cin, cout), lambda n: (0, 0))],
        out_specs=(pl.BlockSpec((1, H * W, cout), lambda n: (n, 0, 0)),
                   pl.BlockSpec((1, 2, cout), lambda n: (n, 0, 0))),
        scratch_shapes=[pltpu.VMEM((H + 2, W + 2, cin), jnp.bfloat16)],
        compiler_params=_compiler_params(1),
        cost_estimate=cost,
    )(x_nhwc_bf16, wmat)
    return y.reshape(N * H * W, cout), jnp.sum(stats, axis=0)


def _finalize(y1, y2, y3, y4, scale, shift):
    R = y1.shape[0]
    cs = (y1.shape[1], y2.shape[1], y3.shape[1], y4.shape[1])
    ctot = sum(cs)
    tile = _row_tile(R)
    in_specs = [pl.BlockSpec((tile, c), lambda i: (i, 0)) for c in cs]
    in_specs += [pl.BlockSpec((1, ctot), lambda i: (0, 0))] * 2
    return pl.pallas_call(
        _finalize_kernel,
        out_shape=jax.ShapeDtypeStruct((R, ctot), jnp.float32),
        grid=(R // tile,),
        in_specs=in_specs,
        out_specs=pl.BlockSpec((tile, ctot), lambda i: (i, 0)),
        compiler_params=_compiler_params(1),
    )(y1, y2, y3, y4, scale, shift)


# ----------------------------------------------------------------------------
# Glue: per-channel BatchNorm finalization (tiny), parameter init, forward
# ----------------------------------------------------------------------------
def _bn_scale_shift(stats, count, gamma, beta):
    """Train-mode BN (biased variance) folded into one scale/shift per channel.
    TODO(synk): E[y^2]-E[y]^2 in f32 can lose precision for very large channel means."""
    mean = stats[0] / count
    var = jnp.maximum(stats[1] / count - mean * mean, 0.0)
    scale = (gamma * lax.rsqrt(var + EPS)).astype(jnp.float32)
    shift = (beta - mean * scale).astype(jnp.float32)
    return scale.reshape(1, -1), shift.reshape(1, -1)


def init_conv_block_params(key, cin, cout, K):
    k1, k2, k3, k4 = jax.random.split(key, 4)
    return dict(
        # conv bias `b` kept for module parity; it is exactly cancelled by the
        # train-mode BatchNorm mean subtraction so the kernels do not use it.
        w=0.1 * jax.random.normal(k1, (cout, cin, K, K), jnp.float32),
        b=0.1 * jax.random.normal(k2, (cout,), jnp.float32),
        gamma=1.0 + 0.1 * jax.random.normal(k3, (cout,), jnp.float32),
        beta=0.1 * jax.random.normal(k4, (cout,), jnp.float32),
        K=K,
        pad=(K - 1) // 2,
    )


def init_inception_params(key, in_channels, out_1x1, red_3x3, out_3x3,
                          red_5x5, out_5x5, out_1x1pool):
    keys = jax.random.split(key, 6)
    return dict(
        b1=init_conv_block_params(keys[0], in_channels, out_1x1, 1),
        b2a=init_conv_block_params(keys[1], in_channels, red_3x3, 1),
        b2b=init_conv_block_params(keys[2], red_3x3, out_3x3, 3),
        b3a=init_conv_block_params(keys[3], in_channels, red_5x5, 1),
        b3b=init_conv_block_params(keys[4], red_5x5, out_5x5, 5),
        b4=init_conv_block_params(keys[5], in_channels, out_1x1pool, 1),
    )


def inception_forward(x_nchw, params):
    """Inception_block.forward — input/output in NCHW like PyTorch (train-mode BN)."""
    x = jnp.transpose(x_nchw, (0, 2, 3, 1))                      # NCHW -> NHWC
    N, H, W, cin = x.shape
    R = N * H * W
    xb = x.astype(jnp.bfloat16)
    x2d = xb.reshape(R, cin)

    p1, p2a, p2b = params["b1"], params["b2a"], params["b2b"]
    p3a, p3b, p4 = params["b3a"], params["b3b"], params["b4"]
    c1 = p1["w"].shape[0]
    r3 = p2a["w"].shape[0]
    r5 = p3a["w"].shape[0]
    c3 = p2b["w"].shape[0]
    c5 = p3b["w"].shape[0]
    c4 = p4["w"].shape[0]

    # Pass 1a: fused 1x1 convs over raw x (branch1 + 3x3-reduce + 5x5-reduce).
    w1x1 = jnp.concatenate(
        [p["w"].reshape(p["w"].shape[0], cin).T for p in (p1, p2a, p3a)],
        axis=1).astype(jnp.bfloat16)
    (y1, yr3, yr5), s_1x1 = _fused_conv1x1(x2d, w1x1, (c1, r3, r5))
    scale1, shift1 = _bn_scale_shift(s_1x1[:, :c1], R, p1["gamma"], p1["beta"])
    scale_r3, shift_r3 = _bn_scale_shift(s_1x1[:, c1:c1 + r3], R,
                                         p2a["gamma"], p2a["beta"])
    scale_r5, shift_r5 = _bn_scale_shift(s_1x1[:, c1 + r3:], R,
                                         p3a["gamma"], p3a["beta"])

    # Pass 1b: 3x3 / 5x5 convs with reduce BN+ReLU and padding fused in-kernel.
    w3 = jnp.transpose(p2b["w"], (2, 3, 1, 0)).reshape(3, 3 * r3, c3).astype(jnp.bfloat16)
    w5 = jnp.transpose(p3b["w"], (2, 3, 1, 0)).reshape(5, 5 * r5, c5).astype(jnp.bfloat16)
    y2, s2 = _convkk(yr3.reshape(N, H, W, r3), w3, scale_r3, shift_r3, 3, H, W)
    y3, s3 = _convkk(yr5.reshape(N, H, W, r5), w5, scale_r5, shift_r5, 5, H, W)
    scale2, shift2 = _bn_scale_shift(s2, R, p2b["gamma"], p2b["beta"])
    scale3, shift3 = _bn_scale_shift(s3, R, p3b["gamma"], p3b["beta"])

    # Pass 1c: branch4 (max pool fused with its 1x1 conv).
    w4 = p4["w"].reshape(c4, cin).T.astype(jnp.bfloat16)
    y4, s4 = _pool_conv1x1(xb, w4)
    scale4, shift4 = _bn_scale_shift(s4, R, p4["gamma"], p4["beta"])

    # Pass 2: fused BN+ReLU + channel concat of all four branches (one store).
    scale = jnp.concatenate([scale1, scale2, scale3, scale4], axis=1)
    shift = jnp.concatenate([shift1, shift2, shift3, shift4], axis=1)
    out = _finalize(y1, y2, y3, y4, scale, shift)                # (R, Ctot) f32
    out = out.reshape(N, H, W, c1 + c3 + c5 + c4)
    return jnp.transpose(out, (0, 3, 1, 2))                      # -> NCHW


# ----------------------------------------------------------------------------
if __name__ == "__main__":
    key = jax.random.PRNGKey(0)
    kx, kp = jax.random.split(key)

    N, Cin, H, W = 2, 4, 16, 16
    out_1x1, red_3x3, out_3x3 = 8, 4, 8
    red_5x5, out_5x5, out_1x1pool = 4, 8, 8

    x = jax.random.normal(kx, (N, Cin, H, W), jnp.float32)
    params = init_inception_params(
        kp, Cin, out_1x1, red_3x3, out_3x3, red_5x5, out_5x5, out_1x1pool
    )

    y = inception_forward(x, params)
    jax.block_until_ready(y)

    assert y.shape == (N, out_1x1 + out_3x3 + out_5x5 + out_1x1pool, H, W), y.shape
    assert bool(jnp.all(jnp.isfinite(y))) and bool(jnp.all(y >= 0.0))
    print("KERNEL_OK")
</pallas_src>

<mosaic_0001>
module attributes {stable_mosaic.version = 11 : i64} {
  func.func @kernel(%arg0: i32, %arg1: memref<256x4xbf16, #tpu.memory_space<vmem>>, %arg2: memref<4x16xbf16, #tpu.memory_space<vmem>>, %arg3: memref<256x8xbf16, #tpu.memory_space<vmem>>, %arg4: memref<256x4xbf16, #tpu.memory_space<vmem>>, %arg5: memref<256x4xbf16, #tpu.memory_space<vmem>>, %arg6: memref<1x2x16xf32, #tpu.memory_space<vmem>>) attributes {dimension_semantics = [#tpu.dimension_semantics<parallel>], iteration_bounds = array<i64: 2>, scalar_prefetch = 0 : i64, scratch_operands = 0 : i64, tpu.core_type = #tpu.core_type<tc>, window_params = [{transform_indices = @transform_0, window_bounds = array<i64: 256, 4>}, {pipeline_mode = #tpu.pipeline_mode<synchronous>, transform_indices = @transform_1, window_bounds = array<i64: 4, 16>}, {transform_indices = @transform_2, window_bounds = array<i64: 256, 8>}, {transform_indices = @transform_3, window_bounds = array<i64: 256, 4>}, {transform_indices = @transform_4, window_bounds = array<i64: 256, 4>}, {transform_indices = @transform_5, window_bounds = array<i64: 1, 2, 16>}]} {
    %c0 = arith.constant 0 : index
    %c0_0 = arith.constant 0 : index
    %0 = vector.load %arg1[%c0, %c0_0] : memref<256x4xbf16, #tpu.memory_space<vmem>>, vector<256x4xbf16>
    %c0_1 = arith.constant 0 : index
    %c0_2 = arith.constant 0 : index
    %1 = vector.load %arg2[%c0_1, %c0_2] : memref<4x16xbf16, #tpu.memory_space<vmem>>, vector<4x16xbf16>
    %cst = arith.constant dense<0.000000e+00> : vector<256x16xf32>
    %2 = tpu.matmul %0, %1, %cst {dimension_numbers = #tpu.dot_dimension_numbers<[1], [0], [0], [1], [0, 0, 1, 1], [], []>} : vector<256x4xbf16>, vector<4x16xbf16>, vector<256x16xf32> -> vector<256x16xf32>
    %3 = vector.extract_strided_slice %2 {offsets = [0, 0], sizes = [256, 8], strides = [1, 1]} : vector<256x16xf32> to vector<256x8xf32>
    %4 = arith.truncf %3 : vector<256x8xf32> to vector<256x8xbf16>
    %c0_3 = arith.constant 0 : index
    %c0_4 = arith.constant 0 : index
    %5 = vector.load %arg3[%c0_3, %c0_4] : memref<256x8xbf16, #tpu.memory_space<vmem>>, vector<256x8xbf16>
    tpu.vector_store %arg3[%c0_3, %c0_4], %4 {strides = array<i32>} : memref<256x8xbf16, #tpu.memory_space<vmem>>, vector<256x8xbf16>,
    %6 = vector.extract_strided_slice %2 {offsets = [0, 8], sizes = [256, 4], strides = [1, 1]} : vector<256x16xf32> to vector<256x4xf32>
    %7 = arith.truncf %6 : vector<256x4xf32> to vector<256x4xbf16>
    %c0_5 = arith.constant 0 : index
    %c0_6 = arith.constant 0 : index
    %8 = vector.load %arg4[%c0_5, %c0_6] : memref<256x4xbf16, #tpu.memory_space<vmem>>, vector<256x4xbf16>
    tpu.vector_store %arg4[%c0_5, %c0_6], %7 {strides = array<i32>} : memref<256x4xbf16, #tpu.memory_space<vmem>>, vector<256x4xbf16>,
    %9 = vector.extract_strided_slice %2 {offsets = [0, 12], sizes = [256, 4], strides = [1, 1]} : vector<256x16xf32> to vector<256x4xf32>
    %10 = arith.truncf %9 : vector<256x4xf32> to vector<256x4xbf16>
    %c0_7 = arith.constant 0 : index
    %c0_8 = arith.constant 0 : index
    %11 = vector.load %arg5[%c0_7, %c0_8] : memref<256x4xbf16, #tpu.memory_space<vmem>>, vector<256x4xbf16>
    tpu.vector_store %arg5[%c0_7, %c0_8], %10 {strides = array<i32>} : memref<256x4xbf16, #tpu.memory_space<vmem>>, vector<256x4xbf16>,
    %cst_9 = arith.constant dense<0.000000e+00> : vector<16xf32>
    %12 = vector.multi_reduction <add>, %2, %cst_9 [0] : vector<256x16xf32> to vector<16xf32>
    %13 = vector.shape_cast %12 : vector<16xf32> to vector<1x16xf32>
    %c0_10 = arith.constant 0 : index
    %c0_11 = arith.constant 0 : index
    %c0_12 = arith.constant 0 : index
    %14 = vector.load %arg6[%c0_10, %c0_11, %c0_12] : memref<1x2x16xf32, #tpu.memory_space<vmem>>, vector<1x1x16xf32>
    %15 = vector.shape_cast %14 : vector<1x1x16xf32> to vector<1x16xf32>
    %16 = vector.shape_cast %13 : vector<1x16xf32> to vector<1x1x16xf32>
    tpu.vector_store %arg6[%c0_10, %c0_11, %c0_12], %16 {strides = array<i32>} : memref<1x2x16xf32, #tpu.memory_space<vmem>>, vector<1x1x16xf32>,
    %17 = arith.mulf %2, %2 : vector<256x16xf32>
    %cst_13 = arith.constant dense<0.000000e+00> : vector<16xf32>
    %18 = vector.multi_reduction <add>, %17, %cst_13 [0] : vector<256x16xf32> to vector<16xf32>
    %19 = vector.shape_cast %18 : vector<16xf32> to vector<1x16xf32>
    %c0_14 = arith.constant 0 : index
    %c1 = arith.constant 1 : index
    %c0_15 = arith.constant 0 : index
    %20 = vector.load %arg6[%c0_14, %c1, %c0_15] : memref<1x2x16xf32, #tpu.memory_space<vmem>>, vector<1x1x16xf32>
    %21 = vector.shape_cast %20 : vector<1x1x16xf32> to vector<1x16xf32>
    %22 = vector.shape_cast %19 : vector<1x16xf32> to vector<1x1x16xf32>
    tpu.vector_store %arg6[%c0_14, %c1, %c0_15], %22 {strides = array<i32>} : memref<1x2x16xf32, #tpu.memory_space<vmem>>, vector<1x1x16xf32>,
    return
  }
  func.func @transform_0(%arg0: i32) -> (i32, i32) {
    %c0_i32 = arith.constant 0 : i32
    %c0_i32_0 = arith.constant 0 : i32
    return %arg0, %c0_i32 : i32, i32
  }
  func.func @transform_1(%arg0: i32) -> (i32, i32) {
    %c0_i32 = arith.constant 0 : i32
    %c0_i32_0 = arith.constant 0 : i32
    %c0_i32_1 = arith.constant 0 : i32
    return %c0_i32, %c0_i32_0 : i32, i32
  }
  func.func @transform_2(%arg0: i32) -> (i32, i32) {
    %c0_i32 = arith.constant 0 : i32
    %c0_i32_0 = arith.constant 0 : i32
    return %arg0, %c0_i32 : i32, i32
  }
  func.func @transform_3(%arg0: i32) -> (i32, i32) {
    %c0_i32 = arith.constant 0 : i32
    %c0_i32_0 = arith.constant 0 : i32
    return %arg0, %c0_i32 : i32, i32
  }
  func.func @transform_4(%arg0: i32) -> (i32, i32) {
    %c0_i32 = arith.constant 0 : i32
    %c0_i32_0 = arith.constant 0 : i32
    return %arg0, %c0_i32 : i32, i32
  }
  func.func @transform_5(%arg0: i32) -> (i32, i32, i32) {
    %c0_i32 = arith.constant 0 : i32
    %c0_i32_0 = arith.constant 0 : i32
    %c0_i32_1 = arith.constant 0 : i32
    return %arg0, %c0_i32, %c0_i32_0 : i32, i32, i32
  }
}

</mosaic_0001>

<bundles_post_ra>
// kernel: tpu_custom_call.1
= control target key start
LH: loop header
LB: loop body
LE: loop exit
PB: predicated region body
PF: predicated region fallthrough
CT: control target
= control target key end

     0   :  { %11 = vsyncpa [#allocation3], 0  ;;  %s2411_s0 = inlined_call_operand.vmem [shape: bf16[512,4], index: 0, kind: input, shape index: {}]   ;;  %s2412_s1 = inlined_call_operand.vmem [shape: bf16[4,16], index: 1, kind: input, shape index: {}]   ;;  %s2413_s2 = inlined_call_operand.vmem [shape: bf16[512,8], index: 2, kind: output, shape index: {0}]   ;;  %s2414_s3 = inlined_call_operand.vmem [shape: bf16[512,4], index: 3, kind: output, shape index: {1}]   ;;  %s2415_s4 = inlined_call_operand.vmem [shape: bf16[512,4], index: 4, kind: output, shape index: {2}]   ;;  %s2416_s5 = inlined_call_operand.hbm [shape: f32[2,2,16], index: 5, kind: output, shape index: {3}]  }
   0x1   :  { %13 = vsyncpa [#allocation3 + $0x1], 0  ;;  %s1680_s18 = smov 0   ;;  %s1682_s19 = smov 0  }
   0x2   :  { %s1684_s20 = smov 0   ;;  %s1686_s21 = smov 0  }
   0x3 LB: > { %s1359_s22 = sadd.s32 4294967295, %s1645_s21   ;;  %s1360_s23 = sadd.s32 4294967294, %s1645_s21   ;;  %s1645_s21 = sphi %s1686_s21, %s2422_s21   ;;  %s1641_s20 = sphi %s1684_s20, %s2421_s20   ;;  %s1637_s19 = sphi %s1682_s19, %s2420_s19   ;;  %s1633_s18 = sphi %s1680_s18, %s2419_s18  }
   0x4   : > { %s1703_s24 = sadd.s32 1, %s1645_s21   ;;  %s151_s25 = sadd.s32 1, %s1641_s20 }
   0x5   : > { %s148_s26 = ssub.s32 %s1645_s21, %s1703_s24  ;;  %p161_p0 = scmp.ne.s32.totalorder %s1641_s20, %s1637_s19 }
   0x6   : > { %p149_p1 = scmp.eq.s32.totalorder %s148_s26, 0  ;;  %p162_p2 = scmp.eq.s32.totalorder %s1359_s22, 1 }
   0x7   : > { %p167_p3 = scmp.ne.s32.totalorder %s1637_s19, %s1633_s18  ;;  %p168_p4 = scmp.eq.s32.totalorder %s1360_s23, 1 }
   0x8   : > { %s1713_s27 = scalar_select %p149_p1, %s1641_s20, %s151_s25  }
   0x9   : > { %p1715_p5 = por %p162_p2, %p161_p0  ;;  %p1719_p6 = por %p168_p4, %p167_p3 }
   0xa   : > { %p1363_p7 = scmp.ge.s32.totalorder %s1645_s21, 1  ;;  %p198_p8 = scmp.lt.s32.totalorder %s1645_s21, 3 }
   0xc   : > { %p199_p9 = pnand %p1363_p7, %p198_p8 }
   0xd   : > { %s1728_s7 = sshll.u32 (!%p199_p9), %s1359_s22, 5  ;;  %s1647_s16 = smov (!%p199_p9), 120  }
   0xe   : > { %202 = sbr.rel (%p199_p9) target bundleno = 472 (0x1d8), region = 28  ;;  %p242_p10 = scmp.lt.s32.totalorder (!%p199_p9), %s1728_s7, 63 }
   0xf   : > { %s1648_s17 = smov (!%p199_p9), 116   ;;  %s238_s22 = sand.u32 (!%p199_p9), 1, %s1637_s19  }
  0x10   : > { %s1364_s23 = sshll.u32 (!%p199_p9), %s238_s22, 1  ;;  %s1201_s13 = scalar_lea.sflag (!%p199_p9), [#allocation3], %s238_s22 }
  0x11   : > { %s240_s25 = scalar_lea.vmem (!%p199_p9), [#allocation2], %s1364_s23 }
  0x13   : > { %v298_v0 = vld [vmem:[%s2412_s1] sm:$0x3]  ;;  %vm428_vm0 = vcmask 1041408   ;;  %s243_s8 = scalar_select %p242_p10, %s1728_s7, 63  ;;  %vm379_vm1 = vcmask 31744   ;;  %vm721_vm2 = vcmask 60416  }
  0x14   : > { %1526 = vmatprep.subr.msk.bf16.mxu0 %vm428_vm0, %v298_v0  ;;  %1527 = vmatprep.subr.msk.bf16.mxu1 %vm428_vm0, %v298_v0  ;;  %v430_v1 = vsel %vm428_vm0, %v298_v0, 0  ;;  %vm1011_vm3 = vcmask 130048   ;;  %vm1081_vm4 = vcmask 122880   ;;  %vm850_vm5 = vcmask 27648  }
  0x15   : > { %1491 = vmatpush3.bf16.msra.mxu0 %v430_v1  ;;  %1525 = vmatpush3.bf16.msra.mxu1 %v430_v1  ;;  %s1732_s9 = sshll.u32 %s243_s8, 2  ;;  %s1226_s8 = sshll.u32 %s240_s25, 4  ;;  %s1227_s8 = int_to_ptr.vmem [resolvable:$true] %s1226_s8 }
  0x16   : > { %s1738_s12 = scalar_lea.vmem %s2411_s0, %s1732_s9  ;;  %s1776_s15 = scalar_lea.vmem %s2413_s2, %s1732_s9 }
  0x17   : > { %v1569_v2 = vld [vmem:[%s1738_s12] sm:$0xff]   ;;  %v1571_v4 = vld [vmem:[%s1738_s12 + $0x8] sm:$0xff]   ;;  %v1573_v6 = vld [vmem:[%s1738_s12 + $0x10] sm:$0xff]   ;;  %s2218_s6 = scalar_lea.vmem %s2414_s3, %s1732_s9  ;;  %s1585_s14 = scalar_lea.vmem %s1227_s8, 32 }
  0x18   : > { %v1570_v3 = vld [vmem:[%s1738_s12 + $0x40] sm:$0xff]   ;;  %1492 = vmatprep.mubr.msk.bf16.mxu0 %vm379_vm1, %v1569_v2  ;;  %v1572_v5 = vld [vmem:[%s1738_s12 + $0x48] sm:$0xff]   ;;  %v1574_v7 = vld [vmem:[%s1738_s12 + $0x18] sm:$0xff]   ;;  %p1586_p11 = scmp.ne.s32.totalorder %s1227_s8, %s1585_s14 }
  0x19   : > { %1508 = vmatprep.mubr.msk.bf16.mxu1 %vm379_vm1, %v1570_v3  ;;  %1493 = vmatmul.mubr.msk.bf16.vlgmr.msra.gmra.mxu0 %vm379_vm1, %v1571_v4  ;;  %v1575_v8 = vld [vmem:[%s1738_s12 + $0x20] sm:$0xff]   ;;  %v1579_v9 = vld [vmem:[%s1738_s12 + $0x50] sm:$0xff]   ;;  %v1580_v10 = vld [vmem:[%s1738_s12 + $0x58] sm:$0xff]  }
  0x1a   : > { %1509 = vmatmul.mubr.msk.bf16.vlgmr.msra.gmra.mxu1 %vm379_vm1, %v1572_v5  ;;  %1496 = vmatprep.mubr.msk.bf16.mxu0 %vm379_vm1, %v1573_v6  ;;  %v1581_v11 = vld [vmem:[%s1738_s12 + $0x60] sm:$0xff]   ;;  %v1576_v12 = vld [vmem:[%s1738_s12 + $0x28] sm:$0xff]   ;;  %v1577_v13 = vld [vmem:[%s1738_s12 + $0x30] sm:$0xff]   ;;  %p1587_p12 = pnand %p1586_p11, %p1715_p5 }
  0x1b   : > { %1512 = vmatprep.mubr.msk.bf16.mxu1 %vm379_vm1, %v1579_v9  ;;  %v1582_v14 = vld [vmem:[%s1738_s12 + $0x68] sm:$0xff]   ;;  %v1583_v15 = vld [vmem:[%s1738_s12 + $0x70] sm:$0xff]   ;;  %v1578_v16 = vld [vmem:[%s1738_s12 + $0x38] sm:$0xff]  }
  0x1c   : > { %v1584_v17 = vld [vmem:[%s1738_s12 + $0x78] sm:$0xff]   ;;  %s2226_s12 = scalar_lea.hbm %s2416_s5, %s1728_s7  ;;  %p1588_p13 = pneg %p1587_p12 }
  0x21   : > { %1497 = vmatmul.mubr.msk.bf16.gmra.mxu0 %vm379_vm1, %v1574_v7 }
  0x22   : > { %1500 = vmatprep.mubr.msk.bf16.mxu0 %vm379_vm1, %v1575_v8  ;;  %1513 = vmatmul.mubr.msk.bf16.gmra.mxu1 %vm379_vm1, %v1580_v10 }
  0x23   : > { %1516 = vmatprep.mubr.msk.bf16.mxu1 %vm379_vm1, %v1581_v11 }
  0x29   : > { %1501 = vmatmul.mubr.msk.bf16.gmra.mxu0 %vm379_vm1, %v1576_v12 }
  0x2a   : > { %1504 = vmatprep.mubr.msk.bf16.mxu0 %vm379_vm1, %v1577_v13  ;;  %1517 = vmatmul.mubr.msk.bf16.gmra.mxu1 %vm379_vm1, %v1582_v14 }
  0x2b   : > { %1520 = vmatprep.mubr.msk.bf16.mxu1 %vm379_vm1, %v1583_v15 }
  0x31   : > { %1505 = vmatmul.mubr.msk.bf16.gmra.mxu0 %vm379_vm1, %v1578_v16 }
  0x32   : > { %1521 = vmatmul.mubr.msk.bf16.gmra.mxu1 %vm379_vm1, %v1584_v17 }
  0xd9   : > { %v1494_v18 = vpop.f32.mrf.mxu0 }
  0xda   : > { %v1443_v19 = vpack.c.bf16 %v1494_v18, %v1494_v18  ;;  %v1778_v20 = vpop.f32.mrf.mxu1  ;;  %v1085_v30 = vmul.f32 %v1494_v18, %v1494_v18  ;;  %v1015_v38 = vsel %vm1011_vm3, %v1494_v18, 0.0 }
  0xdb   : > { %v1459_v21 = vpack.c.bf16 %v1778_v20, %v1778_v20  ;;  %v466_v22 = vpop.f32.mrf.mxu0 }
  0xdc   : > { %724 = vst.msk [vmem:[%s1776_s15 + $0x8] sm:$0xf] %vm721_vm2, %v1443_v19  ;;  %v1784_v23 = vpack.c.bf16 %v466_v22, %v466_v22  ;;  %v1786_v24 = vpop.f32.mrf.mxu1  ;;  %758 = vrot.lane.b32.xlu1 %v1443_v19, %s1647_s16  ;;  %v1083_v27 = vmul.f32 %v466_v22, %v466_v22  ;;  %v1012_v33 = vsel %vm1011_vm3, %v466_v22, 0.0  ;;  %v1118_v47 = vsel %vm1011_vm3, %v1085_v30, 0.0 }
  0xdd   : > { %740 = vst.msk [vmem:[%s1776_s15 + $0x48] sm:$0xf] %vm721_vm2, %v1459_v21  ;;  %v1793_v25 = vpack.c.bf16 %v1786_v24, %v1786_v24  ;;  %790 = vrot.lane.b32.xlu0 %v1459_v21, %s1647_s16  ;;  %v1495_v26 = vpop.f32.mrf.mxu0 }
  0xde   : > { %722 = vst.msk [vmem:[%s1776_s15] sm:$0xf] %vm721_vm2, %v1784_v23  ;;  %v1444_v28 = vpack.c.bf16 %v1495_v26, %v1495_v26  ;;  %v1799_v29 = vpop.f32.mrf.mxu1  ;;  %v1115_v42 = vsel %vm1011_vm3, %v1083_v27, 0.0  ;;  %v1086_v43 = vmul.f32 %v1495_v26, %v1495_v26  ;;  %v1017_v52 = vsel %vm1011_vm3, %v1495_v26, 0.0 }
  0xdf   : > { %738 = vst.msk [vmem:[%s1776_s15 + $0x40] sm:$0xf] %vm721_vm2, %v1793_v25  ;;  %v1806_v31 = vpack.c.bf16 %v1799_v29, %v1799_v29  ;;  %v469_v32 = vpop.f32.mrf.mxu0 }
  0xe0   : > { %725 = vst.msk [vmem:[%s1776_s15 + $0xc] sm:$0xf] %vm721_vm2, %v1444_v28  ;;  %v1811_v34 = vpack.c.bf16 %v469_v32, %v469_v32  ;;  %v1013_v35 = vsel %vm1011_vm3, %v469_v32, 0.0  ;;  %v1084_v36 = vmul.f32 %v469_v32, %v469_v32  ;;  %v1814_v37 = vpop.f32.mrf.mxu1  ;;  %760 = vrot.lane.b32.xlu1 %v1444_v28, %s1647_s16  ;;  %v1120_v60 = vsel %vm1011_vm3, %v1086_v43, 0.0 }
  0xe1   : > { %741 = vst.msk [vmem:[%s1776_s15 + $0x4c] sm:$0xf] %vm721_vm2, %v1806_v31  ;;  %v1014_v39 = vadd.f32 %v1013_v35, %v1012_v33  ;;  %v1823_v40 = vpack.c.bf16 %v1814_v37, %v1814_v37  ;;  %887 = vrot.lane.b32.xlu0 %v1443_v19, %s1648_s17  ;;  %v1498_v41 = vpop.f32.mrf.mxu0 }
  0xe2   : > { %723 = vst.msk [vmem:[%s1776_s15 + $0x4] sm:$0xf] %vm721_vm2, %v1811_v34  ;;  %v1116_v44 = vsel %vm1011_vm3, %v1084_v36, 0.0  ;;  %v1831_v45 = vpack.c.bf16 %v1498_v41, %v1498_v41  ;;  %v1833_v46 = vpop.f32.mrf.mxu1  ;;  %v1089_v61 = vmul.f32 %v1498_v41, %v1498_v41  ;;  %v1023_v1 = vsel %vm1011_vm3, %v1498_v41, 0.0 }
  0xe3   : > { %v1016_v48 = vadd.f32 %v1015_v38, %v1014_v39  ;;  %v1117_v49 = vadd.f32 %v1116_v44, %v1115_v42  ;;  %739 = vst.msk [vmem:[%s1776_s15 + $0x44] sm:$0xf] %vm721_vm2, %v1823_v40  ;;  %v482_v50 = vpop.f32.mrf.mxu0  ;;  %v1841_v51 = vpack.c.bf16 %v1833_v46, %v1833_v46 }
  0xe4   : > { %728 = vst.msk [vmem:[%s1776_s15 + $0x18] sm:$0xf] %vm721_vm2, %v1831_v45  ;;  %v1847_v53 = vpack.c.bf16 %v482_v50, %v482_v50  ;;  %v1019_v54 = vsel %vm1011_vm3, %v482_v50, 0.0  ;;  %v1087_v55 = vmul.f32 %v482_v50, %v482_v50  ;;  %792 = vrot.lane.b32.xlu1 %v1806_v31, %s1647_s16  ;;  %v1852_v56 = vpop.f32.mrf.mxu1  ;;  %v1126_v14 = vsel %vm1011_vm3, %v1089_v61, 0.0 }
  0xe5   : > { %v1119_v57 = vadd.f32 %v1118_v47, %v1117_v49  ;;  %v1018_v58 = vadd.f32 %v1017_v52, %v1016_v48  ;;  %919 = vrot.lane.b32.xlu0 %v1459_v21, %s1648_s17  ;;  %v1499_v59 = vpop.f32.mrf.mxu0  ;;  %744 = vst.msk [vmem:[%s1776_s15 + $0x58] sm:$0xf] %vm721_vm2, %v1841_v51  ;;  %v1870_v5 = vpack.c.bf16 %v1852_v56, %v1852_v56 }
  0xe6   : > { %726 = vst.msk [vmem:[%s1776_s15 + $0x10] sm:$0xf] %vm721_vm2, %v1847_v53  ;;  %v1122_v62 = vsel %vm1011_vm3, %v1087_v55, 0.0  ;;  %v1863_v63 = vpack.c.bf16 %v1499_v59, %v1499_v59  ;;  %v1865_v0 = vpop.f32.mrf.mxu1  ;;  %v1090_v6 = vmul.f32 %v1499_v59, %v1499_v59  ;;  %v1025_v15 = vsel %vm1011_vm3, %v1499_v59, 0.0 }
  0xe7   : > { %v1020_v2 = vadd.f32 %v1019_v54, %v1018_v58  ;;  %v1121_v3 = vadd.f32 %v1120_v60, %v1119_v57  ;;  %v485_v4 = vpop.f32.mrf.mxu0  ;;  %742 = vst.msk [vmem:[%s1776_s15 + $0x50] sm:$0xf] %vm721_vm2, %v1870_v5  ;;  %v1898_v26 = vpack.c.bf16 %v1865_v0, %v1865_v0 }
  0xe8   : > { %729 = vst.msk [vmem:[%s1776_s15 + $0x1c] sm:$0xf] %vm721_vm2, %v1863_v63  ;;  %v1875_v7 = vpack.c.bf16 %v485_v4, %v485_v4  ;;  %v1021_v8 = vsel %vm1011_vm3, %v485_v4, 0.0  ;;  %v1088_v9 = vmul.f32 %v485_v4, %v485_v4  ;;  %889 = vrot.lane.b32.xlu1 %v1444_v28, %s1648_s17  ;;  %v1879_v10 = vpop.f32.mrf.mxu1  ;;  %v1128_v27 = vsel %vm1011_vm3, %v1090_v6, 0.0 }
  0xe9   : > { %v1123_v11 = vadd.f32 %v1122_v62, %v1121_v3  ;;  %v1022_v12 = vadd.f32 %v1021_v8, %v1020_v2  ;;  %754 = vrot.lane.b32.xlu0 %v1784_v23, %s1647_s16  ;;  %v1502_v13 = vpop.f32.mrf.mxu0  ;;  %745 = vst.msk [vmem:[%s1776_s15 + $0x5c] sm:$0xf] %vm721_vm2, %v1898_v26  ;;  %v1927_v49 = vpack.c.bf16 %v1879_v10, %v1879_v10 }
  0xea   : > { %727 = vst.msk [vmem:[%s1776_s15 + $0x14] sm:$0xf] %vm721_vm2, %v1875_v7  ;;  %v1124_v16 = vsel %vm1011_vm3, %v1088_v9, 0.0  ;;  %v1892_v17 = vpack.c.bf16 %v1502_v13, %v1502_v13  ;;  %v1894_v18 = vpop.f32.mrf.mxu1  ;;  %v1093_v39 = vmul.f32 %v1502_v13, %v1502_v13  ;;  %v1031_v43 = vsel %vm1011_vm3, %v1502_v13, 0.0 }
  0xeb   : > { %v1024_v19 = vadd.f32 %v1023_v1, %v1022_v12  ;;  %v1125_v21 = vadd.f32 %v1124_v16, %v1123_v11  ;;  %v498_v22 = vpop.f32.mrf.mxu0  ;;  %743 = vst.msk [vmem:[%s1776_s15 + $0x54] sm:$0xf] %vm721_vm2, %v1927_v49  ;;  %v1954_v6 = vpack.c.bf16 %v1894_v18, %v1894_v18 }
  0xec   : > { %732 = vst.msk [vmem:[%s1776_s15 + $0x28] sm:$0xf] %vm721_vm2, %v1892_v17  ;;  %v1904_v28 = vpack.c.bf16 %v498_v22, %v498_v22  ;;  %v1027_v30 = vsel %vm1011_vm3, %v498_v22, 0.0  ;;  %v1091_v32 = vmul.f32 %v498_v22, %v498_v22  ;;  %921 = vrot.lane.b32.xlu1 %v1806_v31, %s1648_s17  ;;  %v1909_v33 = vpop.f32.mrf.mxu1  ;;  %v1134_v61 = vsel %vm1011_vm3, %v1093_v39, 0.0 }
  0xed   : > { %v1127_v35 = vadd.f32 %v1126_v14, %v1125_v21  ;;  %v1026_v36 = vadd.f32 %v1025_v15, %v1024_v19  ;;  %786 = vrot.lane.b32.xlu0 %v1793_v25, %s1647_s16  ;;  %v1503_v38 = vpop.f32.mrf.mxu0  ;;  %748 = vst.msk [vmem:[%s1776_s15 + $0x68] sm:$0xf] %vm721_vm2, %v1954_v6 }
  0xee   : > { %730 = vst.msk [vmem:[%s1776_s15 + $0x20] sm:$0xf] %vm721_vm2, %v1904_v28  ;;  %v1130_v41 = vsel %vm1011_vm3, %v1091_v32, 0.0  ;;  %v1920_v42 = vpack.c.bf16 %v1503_v38, %v1503_v38  ;;  %v1922_v31 = vpop.f32.mrf.mxu1  ;;  %v1094_v50 = vmul.f32 %v1503_v38, %v1503_v38  ;;  %v1033_v62 = vsel %vm1011_vm3, %v1503_v38, 0.0 }
  0xef   : > { %v1028_v44 = vadd.f32 %v1027_v30, %v1026_v36  ;;  %v1129_v47 = vadd.f32 %v1128_v27, %v1127_v35  ;;  %v501_v48 = vpop.f32.mrf.mxu0 }
  0xf0   : > { %733 = vst.msk [vmem:[%s1776_s15 + $0x2c] sm:$0xf] %vm721_vm2, %v1920_v42  ;;  %v1932_v52 = vpack.c.bf16 %v501_v48, %v501_v48  ;;  %v1029_v54 = vsel %vm1011_vm3, %v501_v48, 0.0  ;;  %v1092_v55 = vmul.f32 %v501_v48, %v501_v48  ;;  %788 = vrot.lane.b32.xlu1 %v1823_v40, %s1647_s16  ;;  %v1937_v57 = vpop.f32.mrf.mxu1  ;;  %v1136_v9 = vsel %vm1011_vm3, %v1094_v50, 0.0 }
  0xf1   : > { %v1131_v58 = vadd.f32 %v1130_v41, %v1129_v47  ;;  %v1030_v59 = vadd.f32 %v1029_v54, %v1028_v44  ;;  %883 = vrot.lane.b32.xlu0 %v1784_v23, %s1648_s17  ;;  %v1506_v60 = vpop.f32.mrf.mxu0 }
  0xf2   : > { %731 = vst.msk [vmem:[%s1776_s15 + $0x24] sm:$0xf] %vm721_vm2, %v1932_v52  ;;  %v1132_v1 = vsel %vm1011_vm3, %v1092_v55, 0.0  ;;  %v1950_v2 = vpack.c.bf16 %v1506_v60, %v1506_v60  ;;  %v1956_v8 = vpop.f32.mrf.mxu1  ;;  %v1097_v19 = vmul.f32 %v1506_v60, %v1506_v60  ;;  %v1039_v27 = vsel %vm1011_vm3, %v1506_v60, 0.0 }
  0xf3   : > { %v1032_v3 = vadd.f32 %v1031_v43, %v1030_v59  ;;  %v1133_v4 = vadd.f32 %v1132_v1, %v1131_v58  ;;  %v514_v23 = vpop.f32.mrf.mxu0  ;;  %v2010_v58 = vpack.c.bf16 %v1937_v57, %v1937_v57  ;;  %v1099_v60 = vmul.f32 %v1786_v24, %v1786_v24 }
  0xf4   : > { %736 = vst.msk [vmem:[%s1776_s15 + $0x38] sm:$0xf] %vm721_vm2, %v1950_v2  ;;  %v1962_v11 = vpack.c.bf16 %v514_v23, %v514_v23  ;;  %v1035_v12 = vsel %vm1011_vm3, %v514_v23, 0.0  ;;  %v1095_v13 = vmul.f32 %v514_v23, %v514_v23  ;;  %885 = vrot.lane.b32.xlu1 %v1811_v34, %s1648_s17  ;;  %v1983_v36 = vpop.f32.mrf.mxu1  ;;  %v1142_v48 = vsel %vm1011_vm3, %v1097_v19, 0.0 }
  0xf5   : > { %v1135_v14 = vadd.f32 %v1134_v61, %v1133_v4  ;;  %v1034_v15 = vadd.f32 %v1033_v62, %v1032_v3  ;;  %915 = vrot.lane.b32.xlu0 %v1793_v25, %s1648_s17  ;;  %v1507_v16 = vpop.f32.mrf.mxu0  ;;  %v1981_v25 = vpack.c.bf16 %v1909_v33, %v1909_v33  ;;  %v2024_v62 = vpack.c.bf16 %v1956_v8, %v1956_v8 }
  0xf6   : > { %734 = vst.msk [vmem:[%s1776_s15 + $0x30] sm:$0xf] %vm721_vm2, %v1962_v11  ;;  %v1138_v21 = vsel %vm1011_vm3, %v1095_v13, 0.0  ;;  %v1976_v22 = vpack.c.bf16 %v1507_v16, %v1507_v16  ;;  %v1098_v38 = vmul.f32 %v1507_v16, %v1507_v16  ;;  %v1041_v50 = vsel %vm1011_vm3, %v1507_v16, 0.0  ;;  %v2012_v59 = vpop.f32.mrf.mxu1  ;;  %747 = vst.msk [vmem:[%s1776_s15 + $0x64] sm:$0xf] %vm721_vm2, %v2010_v58 }
  0xf7   : > { %v1036_v30 = vadd.f32 %v1035_v12, %v1034_v15  ;;  %v1137_v32 = vadd.f32 %v1136_v9, %v1135_v14  ;;  %v517_v35 = vpop.f32.mrf.mxu0  ;;  %746 = vst.msk [vmem:[%s1776_s15 + $0x60] sm:$0xf] %vm721_vm2, %v1981_v25  ;;  %v1043_v4 = vsel %vm1011_vm3, %v1786_v24, 0.0  ;;  %v1100_v23 = vmul.f32 %v1814_v37, %v1814_v37  ;;  %752 = vst.msk [vmem:[%s1776_s15 + $0x78] sm:$0xf] %vm721_vm2, %v2024_v62 }
  0xf8   : > { %737 = vst.msk [vmem:[%s1776_s15 + $0x3c] sm:$0xf] %vm721_vm2, %v1976_v22  ;;  %v1988_v39 = vpack.c.bf16 %v517_v35, %v517_v35  ;;  %v1037_v41 = vsel %vm1011_vm3, %v517_v35, 0.0  ;;  %v1096_v43 = vmul.f32 %v517_v35, %v517_v35  ;;  %917 = vrot.lane.b32.xlu1 %v1823_v40, %s1648_s17  ;;  %v2006_v40 = vpack.c.bf16 %v1922_v31, %v1922_v31  ;;  %v2046_v15 = vpop.f32.mrf.mxu1 }
  0xf9   : > { %v1139_v44 = vadd.f32 %v1138_v21, %v1137_v32  ;;  %v1038_v47 = vadd.f32 %v1037_v41, %v1036_v30  ;;  %756 = vrot.lane.b32.xlu0 %v1811_v34, %s1647_s16  ;;  %v1144_v61 = vsel %vm1011_vm3, %v1098_v38, 0.0  ;;  %v2040_v9 = vpack.c.bf16 %v1983_v36, %v1983_v36 }
  0xfa   : > { %735 = vst.msk [vmem:[%s1776_s15 + $0x34] sm:$0xf] %vm721_vm2, %v1988_v39  ;;  %v1140_v54 = vsel %vm1011_vm3, %v1096_v43, 0.0  ;;  %749 = vst.msk [vmem:[%s1776_s15 + $0x6c] sm:$0xf] %vm721_vm2, %v2006_v40  ;;  %v2044_v14 = vpack.c.bf16 %v2012_v59, %v2012_v59  ;;  %v1101_v24 = vmul.f32 %v1778_v20, %v1778_v20  ;;  %v1146_v16 = vsel %vm1011_vm3, %v1099_v60, 0.0 }
  0xfb   : > { %v1040_v55 = vadd.f32 %v1039_v27, %v1038_v47  ;;  %v1141_v34 = vadd.f32 %v1140_v54, %v1139_v44  ;;  %v1045_v19 = vsel %vm1011_vm3, %v1814_v37, 0.0  ;;  %750 = vst.msk [vmem:[%s1776_s15 + $0x70] sm:$0xf] %vm721_vm2, %v2040_v9  ;;  %v2060_v21 = vpack.c.bf16 %v2046_v15, %v2046_v15 }
  0xfc   : > { %768 = vrot.lane.b32.xlu1 %v1863_v63, %s1647_s16  ;;  %753 = vst.msk [vmem:[%s1776_s15 + $0x7c] sm:$0xf] %vm721_vm2, %v2044_v14  ;;  %v1047_v37 = vsel %vm1011_vm3, %v1778_v20, 0.0  ;;  %v1102_v32 = vmul.f32 %v1799_v29, %v1799_v29  ;;  %v1148_v35 = vsel %vm1011_vm3, %v1100_v23, 0.0  ;;  %v1150_v43 = vsel %vm1011_vm3, %v1101_v24, 0.0 }
  0xfd   : > { %v1042_v1 = vadd.f32 %v1041_v50, %v1040_v55  ;;  %v1143_v3 = vadd.f32 %v1142_v48, %v1141_v34  ;;  %766 = vrot.lane.b32.xlu0 %v1831_v45, %s1647_s16  ;;  %751 = vst.msk [vmem:[%s1776_s15 + $0x74] sm:$0xf] %vm721_vm2, %v2060_v21  ;;  %v1049_v44 = vsel %vm1011_vm3, %v1799_v29, 0.0  ;;  %v1103_v47 = vmul.f32 %v1852_v56, %v1852_v56  ;;  %s1649_s15 = smov [#allocation2]  }
  0xfe   : > { %v1152_v50 = vsel %vm1011_vm3, %v1102_v32, 0.0  ;;  %v1051_v54 = vsel %vm1011_vm3, %v1852_v56, 0.0  ;;  %v1104_v55 = vmul.f32 %v1879_v10, %v1879_v10  ;;  %v1105_v60 = vmul.f32 %v1833_v46, %v1833_v46  ;;  %s1589_s23 = sshll.u32 %s1649_s15, 4  ;;  %s1590_s23 = int_to_ptr.vmem [resolvable:$false] %s1589_s23 }
  0xff   : > { %v1044_v12 = vadd.f32 %v1043_v4, %v1042_v1  ;;  %v1145_v13 = vadd.f32 %v1144_v61, %v1143_v3  ;;  %v1053_v61 = vsel %vm1011_vm3, %v1879_v10, 0.0  ;;  %v1055_v56 = vsel %vm1011_vm3, %v1833_v46, 0.0  ;;  %p1592_p0 = scmp.lt.s32.totalorder %s1227_s8, %s1590_s23 }
 0x100   : > { %800 = vrot.lane.b32.xlu1 %v1898_v26, %s1647_s16  ;;  %v1106_v3 = vmul.f32 %v1865_v0, %v1865_v0  ;;  %v1156_v4 = vsel %vm1011_vm3, %v1104_v55, 0.0  ;;  %v1107_v23 = vmul.f32 %v1909_v33, %v1909_v33  ;;  %v1108_v46 = vmul.f32 %v1937_v57, %v1937_v57 }
 0x101   : > { %v1046_v27 = vadd.f32 %v1045_v19, %v1044_v12  ;;  %v1147_v30 = vadd.f32 %v1146_v16, %v1145_v13  ;;  %798 = vrot.lane.b32.xlu0 %v1841_v51, %s1647_s16  ;;  %v1057_v13 = vsel %vm1011_vm3, %v1865_v0, 0.0  ;;  %v1063_v32 = vsel %vm1011_vm3, %v1894_v18, 0.0 }
 0x102   : > { %v1160_v19 = vsel %vm1011_vm3, %v1106_v3, 0.0  ;;  %v1162_v0 = vsel %vm1011_vm3, %v1107_v23, 0.0 }
 0x103   : > { %v1149_v38 = vadd.f32 %v1148_v35, %v1147_v30  ;;  %v1048_v41 = vadd.f32 %v1047_v37, %v1046_v27  ;;  %v1109_v27 = vmul.f32 %v1894_v18, %v1894_v18  ;;  %v1110_v35 = vmul.f32 %v1922_v31, %v1922_v31 }
 0x104   : > { %897 = vrot.lane.b32.xlu1 %v1863_v63, %s1648_s17  ;;  %v1154_v63 = vsel %vm1011_vm3, %v1103_v47, 0.0  ;;  %v1111_v18 = vmul.f32 %v1983_v36, %v1983_v36 }
 0x105   : > { %v1050_v20 = vadd.f32 %v1049_v44, %v1048_v41  ;;  %v1151_v48 = vadd.f32 %v1150_v43, %v1149_v38  ;;  %895 = vrot.lane.b32.xlu0 %v1831_v45, %s1648_s17  ;;  %v1164_v38 = vsel %vm1011_vm3, %v1108_v46, 0.0  ;;  %v1065_v44 = vsel %vm1011_vm3, %v1922_v31, 0.0 }
 0x106   : > { %v1113_v31 = vmul.f32 %v1956_v8, %v1956_v8 }
 0x107   : > { %v1052_v29 = vadd.f32 %v1051_v54, %v1050_v20  ;;  %v1153_v34 = vadd.f32 %v1152_v50, %v1151_v48  ;;  %v1168_v48 = vsel %vm1011_vm3, %v1110_v35, 0.0  ;;  %v1067_v50 = vsel %vm1011_vm3, %v1983_v36, 0.0 }
 0x108   : > { %929 = vrot.lane.b32.xlu1 %v1898_v26, %s1648_s17  ;;  %v1158_v26 = vsel %vm1011_vm3, %v1105_v60, 0.0  ;;  %v1112_v54 = vmul.f32 %v2046_v15, %v2046_v15  ;;  %v1069_v60 = vsel %vm1011_vm3, %v2046_v15, 0.0  ;;  %v1174_v15 = vsel %vm1011_vm3, %v1113_v31, 0.0 }
 0x109   : > { %v1054_v45 = vadd.f32 %v1053_v61, %v1052_v29  ;;  %v1155_v1 = vadd.f32 %v1154_v63, %v1153_v34  ;;  %927 = vrot.lane.b32.xlu0 %v1841_v51, %s1648_s17  ;;  %v1059_v51 = vsel %vm1011_vm3, %v1909_v33, 0.0  ;;  %v1061_v33 = vsel %vm1011_vm3, %v1937_v57, 0.0 }
 0x10a   : > { %v1166_v57 = vsel %vm1011_vm3, %v1109_v27, 0.0  ;;  %v1170_v34 = vsel %vm1011_vm3, %v1111_v18, 0.0  ;;  %v1114_v61 = vmul.f32 %v2012_v59, %v2012_v59 }
 0x10b   : > { %v1056_v10 = vadd.f32 %v1055_v56, %v1054_v45  ;;  %v1157_v12 = vadd.f32 %v1156_v4, %v1155_v1  ;;  %v1172_v45 = vsel %vm1011_vm3, %v1112_v54, 0.0  ;;  %v1073_v56 = vsel %vm1011_vm3, %v2012_v59, 0.0 }
 0x10c   : > { %764 = vrot.lane.b32.xlu1 %v1875_v7, %s1647_s16  ;;  %v1176_v4 = vsel %vm1011_vm3, %v1114_v61, 0.0 }
 0x10d   : > { %v1159_v24 = vadd.f32 %v1158_v26, %v1157_v12  ;;  %v1058_v16 = vadd.f32 %v1057_v13, %v1056_v10  ;;  %762 = vrot.lane.b32.xlu0 %v1847_v53, %s1647_s16 }
 0x10f   : > { %v1060_v30 = vadd.f32 %v1059_v51, %v1058_v16  ;;  %v1161_v37 = vadd.f32 %v1160_v19, %v1159_v24 }
 0x110   : > { %796 = vrot.lane.b32.xlu1 %v1927_v49, %s1647_s16 }
 0x111   : > { %v1163_v41 = vadd.f32 %v1162_v0, %v1161_v37  ;;  %v1062_v43 = vadd.f32 %v1061_v33, %v1060_v30  ;;  %794 = vrot.lane.b32.xlu0 %v1870_v5, %s1647_s16 }
 0x113   : > { %v1064_v47 = vadd.f32 %v1063_v32, %v1062_v43  ;;  %v1165_v20 = vadd.f32 %v1164_v38, %v1163_v41 }
 0x114   : > { %893 = vrot.lane.b32.xlu1 %v1875_v7, %s1648_s17  ;;  %v1071_v7 = vsel %vm1011_vm3, %v1956_v8, 0.0 }
 0x115   : > { %v1167_v55 = vadd.f32 %v1166_v57, %v1165_v20  ;;  %v1066_v29 = vadd.f32 %v1065_v44, %v1064_v47  ;;  %891 = vrot.lane.b32.xlu0 %v1847_v53, %s1648_s17 }
 0x117   : > { %v1068_v36 = vadd.f32 %v1067_v50, %v1066_v29  ;;  %v1169_v63 = vadd.f32 %v1168_v48, %v1167_v55 }
 0x118   : > { %925 = vrot.lane.b32.xlu1 %v1927_v49, %s1648_s17 }
 0x119   : > { %v1171_v53 = vadd.f32 %v1170_v34, %v1169_v63  ;;  %v1070_v1 = vadd.f32 %v1069_v60, %v1068_v36  ;;  %923 = vrot.lane.b32.xlu0 %v1870_v5, %s1648_s17 }
 0x11b   : > { %v1072_v8 = vadd.f32 %v1071_v7, %v1070_v1  ;;  %v1173_v3 = vadd.f32 %v1172_v45, %v1171_v53 }
 0x11c   : > { %776 = vrot.lane.b32.xlu1 %v1920_v42, %s1647_s16 }
 0x11d   : > { %v1074_v23 = vadd.f32 %v1073_v56, %v1072_v8  ;;  %v1175_v49 = vadd.f32 %v1174_v15, %v1173_v3  ;;  %774 = vrot.lane.b32.xlu0 %v1892_v17, %s1647_s16 }
 0x11f   : > { %v1075_v5 = vrot.slane %v1074_v23, 4  ;;  %v1177_v10 = vadd.f32 %v1176_v4, %v1175_v49 }
 0x120   : > { %808 = vrot.lane.b32.xlu1 %v2006_v40, %s1647_s16 }
 0x121   : > { %v1076_v12 = vadd.f32 %v1075_v5, %v1074_v23  ;;  %v1178_v59 = vrot.slane %v1177_v10, 4  ;;  %806 = vrot.lane.b32.xlu0 %v1954_v6, %s1647_s16 }
 0x123   : > { %v1077_v26 = vrot.slane %v1076_v12, 2  ;;  %v1179_v13 = vadd.f32 %v1178_v59, %v1177_v10 }
 0x124   : > { %905 = vrot.lane.b32.xlu1 %v1920_v42, %s1648_s17 }
 0x125   : > { %v1078_v51 = vadd.f32 %v1077_v26, %v1076_v12  ;;  %v1180_v46 = vrot.slane %v1179_v13, 2  ;;  %903 = vrot.lane.b32.xlu0 %v1892_v17, %s1648_s17 }
 0x127   : > { %v1079_v24 = vrot.slane %v1078_v51, 1  ;;  %v1181_v16 = vadd.f32 %v1180_v46, %v1179_v13 }
 0x128   : > { %937 = vrot.lane.b32.xlu1 %v2006_v40, %s1648_s17 }
 0x129   : > { %935 = vrot.lane.b32.xlu0 %v1954_v6, %s1648_s17  ;;  %v1080_v19 = vadd.f32 %v1079_v24, %v1078_v51  ;;  %v1182_v27 = vrot.slane %v1181_v16, 1 }
 0x12b   : > { %1082 = vst.msk [vmem:[%s240_s25] sm:$0x1] %vm1081_vm4, %v1080_v19  ;;  %v1183_v42 = vadd.f32 %v1182_v27, %v1181_v16 }
 0x12c   : > { %772 = vrot.lane.b32.xlu1 %v1932_v52, %s1647_s16 }
 0x12d   : > { %770 = vrot.lane.b32.xlu0 %v1904_v28, %s1647_s16  ;;  %1184 = vst.msk [vmem:[%s240_s25 + $0x1] sm:$0x1] %vm1081_vm4, %v1183_v42  ;;  %s1591_s25 = scalar_lea.vmem %s1590_s23, 64 }
 0x12e   : > { %p1593_p1 = scmp.lt.s32.totalorder %s1591_s25, %s1585_s14 }
 0x130   : > { %804 = vrot.lane.b32.xlu1 %v2010_v58, %s1647_s16  ;;  %p1594_p2 = por %p1593_p1, %p1592_p0 }
 0x131   : > { %802 = vrot.lane.b32.xlu0 %v1981_v25, %s1647_s16 }
 0x132   : > { %p1595_p3 = pnand %p1594_p2, %p1588_p13 }
 0x134   : > { %901 = vrot.lane.b32.xlu1 %v1932_v52, %s1648_s17 }
 0x135   : > { %899 = vrot.lane.b32.xlu0 %v1904_v28, %s1648_s17 }
 0x138   : > { %933 = vrot.lane.b32.xlu1 %v2010_v58, %s1648_s17 }
 0x139   : > { %931 = vrot.lane.b32.xlu0 %v1981_v25, %s1648_s17 }
 0x13c   : > { %784 = vrot.lane.b32.xlu1 %v1976_v22, %s1647_s16 }
 0x13d   : > { %782 = vrot.lane.b32.xlu0 %v1950_v2, %s1647_s16 }
 0x140   : > { %816 = vrot.lane.b32.xlu1 %v2044_v14, %s1647_s16 }
 0x141   : > { %814 = vrot.lane.b32.xlu0 %v2024_v62, %s1647_s16 }
 0x144   : > { %913 = vrot.lane.b32.xlu1 %v1976_v22, %s1648_s17 }
 0x145   : > { %911 = vrot.lane.b32.xlu0 %v1950_v2, %s1648_s17 }
 0x148   : > { %780 = vrot.lane.b32.xlu1 %v1988_v39, %s1647_s16 }
 0x149   : > { %778 = vrot.lane.b32.xlu0 %v1962_v11, %s1647_s16 }
 0x14c   : > { %812 = vrot.lane.b32.xlu1 %v2060_v21, %s1647_s16 }
 0x14d   : > { %810 = vrot.lane.b32.xlu0 %v2040_v9, %s1647_s16 }
 0x14e   : > { %v759_v17 = vpop.permute.xlu1 %758 }
 0x14f   : > { %1598 = shalt.err (!%p1595_p3)
}
 0x150   : > { %s1599_s7 = scalar_lea.hbm %s2226_s12, 32  ;;  %s1603_s26 = scalar_lea.hbm %s2416_s5, 64 }
 0x151   : > { %p1600_p4 = scmp.ne.s32.totalorder %s2226_s12, %s1599_s7  ;;  %p1604_p9 = scmp.lt.s32.totalorder %s2226_s12, %s2416_s5 }
 0x152   : > { %p1605_p10 = scmp.lt.s32.totalorder %s1603_s26, %s1599_s7 }
 0x153   : > { %p1601_p7 = pnand %p1600_p4, %p1715_p5 }
 0x154   : > { %p1606_p11 = por %p1605_p10, %p1604_p9 }
 0x155   : > { %p1602_p8 = pneg %p1601_p7 }
 0x157   : > { %p1607_p12 = pnand %p1606_p11, %p1602_p8 }
 0x159   : > { %1610 = shalt.err (!%p1607_p12)
}
 0x15a   : > { %1528 = dma.vmem_to_hbm [thread:$0]  (%p1715_p5), %s1227_s8, 32, %s2226_s12, %s1201_s13   ;;  %v791_v28 = vpop.permute.xlu0 %790  ;;  %853 = vst.msk [vmem:[%s2218_s6 + $0x8] sm:$0xf] %vm850_vm5, %v759_v17  ;;  %909 = vrot.lane.b32.xlu1 %v1988_v39, %s1648_s17  ;;  %907 = vrot.lane.b32.xlu0 %v1962_v11, %s1648_s17  ;;  %v761_v52 = vpop.permute.xlu1 %760 }
 0x15b   : > { %869 = vst.msk [vmem:[%s2218_s6 + $0x48] sm:$0xf] %vm850_vm5, %v791_v28  ;;  %s2260_s14 = scalar_lea.vmem %s2415_s4, %s1732_s9  ;;  %854 = vst.msk [vmem:[%s2218_s6 + $0xc] sm:$0xf] %vm850_vm5, %v761_v52 }
 0x15e   : > { %v888_v2 = vpop.permute.xlu0 %887  ;;  %941 = vrot.lane.b32.xlu1 %v2060_v21, %s1648_s17  ;;  %939 = vrot.lane.b32.xlu0 %v2040_v9, %s1648_s17  ;;  %v793_v6 = vpop.permute.xlu1 %792 }
 0x15f   : > { %981 = vst.msk [vmem:[%s2260_s14 + $0x8] sm:$0xf] %vm850_vm5, %v888_v2  ;;  %870 = vst.msk [vmem:[%s2218_s6 + $0x4c] sm:$0xf] %vm850_vm5, %v793_v6 }
 0x162   : > { %v920_v11 = vpop.permute.xlu0 %919  ;;  %945 = vrot.lane.b32.xlu1 %v2044_v14, %s1648_s17  ;;  %943 = vrot.lane.b32.xlu0 %v2024_v62, %s1648_s17  ;;  %v890_v22 = vpop.permute.xlu1 %889 }
 0x163   : > { %997 = vst.msk [vmem:[%s2260_s14 + $0x48] sm:$0xf] %vm850_vm5, %v920_v11  ;;  %982 = vst.msk [vmem:[%s2260_s14 + $0xc] sm:$0xf] %vm850_vm5, %v890_v22 }
 0x166   : > { %v755_v25 = vpop.permute.xlu0 %754  ;;  %v922_v39 = vpop.permute.xlu1 %921 }
 0x167   : > { %851 = vst.msk [vmem:[%s2218_s6] sm:$0xf] %vm850_vm5, %v755_v25  ;;  %998 = vst.msk [vmem:[%s2260_s14 + $0x4c] sm:$0xf] %vm850_vm5, %v922_v39 }
 0x16a   : > { %v787_v40 = vpop.permute.xlu0 %786  ;;  %v789_v58 = vpop.permute.xlu1 %788 }
 0x16b   : > { %867 = vst.msk [vmem:[%s2218_s6 + $0x40] sm:$0xf] %vm850_vm5, %v787_v40  ;;  %868 = vst.msk [vmem:[%s2218_s6 + $0x44] sm:$0xf] %vm850_vm5, %v789_v58 }
 0x16e   : > { %v884_v9 = vpop.permute.xlu0 %883  ;;  %v886_v62 = vpop.permute.xlu1 %885 }
 0x16f   : > { %979 = vst.msk [vmem:[%s2260_s14] sm:$0xf] %vm850_vm5, %v884_v9  ;;  %980 = vst.msk [vmem:[%s2260_s14 + $0x4] sm:$0xf] %vm850_vm5, %v886_v62 }
 0x172   : > { %v916_v14 = vpop.permute.xlu0 %915  ;;  %v918_v21 = vpop.permute.xlu1 %917 }
 0x173   : > { %995 = vst.msk [vmem:[%s2260_s14 + $0x40] sm:$0xf] %vm850_vm5, %v916_v14  ;;  %996 = vst.msk [vmem:[%s2260_s14 + $0x44] sm:$0xf] %vm850_vm5, %v918_v21 }
 0x176   : > { %v757_v0 = vpop.permute.xlu0 %756  ;;  %v769_v33 = vpop.permute.xlu1 %768 }
 0x177   : > { %852 = vst.msk [vmem:[%s2218_s6 + $0x4] sm:$0xf] %vm850_vm5, %v757_v0  ;;  %858 = vst.msk [vmem:[%s2218_s6 + $0x1c] sm:$0xf] %vm850_vm5, %v769_v33 }
 0x17a   : > { %v767_v30 = vpop.permute.xlu0 %766  ;;  %v801_v37 = vpop.permute.xlu1 %800 }
 0x17b   : > { %857 = vst.msk [vmem:[%s2218_s6 + $0x18] sm:$0xf] %vm850_vm5, %v767_v30  ;;  %874 = vst.msk [vmem:[%s2218_s6 + $0x5c] sm:$0xf] %vm850_vm5, %v801_v37 }
 0x17e   : > { %v799_v32 = vpop.permute.xlu0 %798  ;;  %v898_v35 = vpop.permute.xlu1 %897 }
 0x17f   : > { %873 = vst.msk [vmem:[%s2218_s6 + $0x58] sm:$0xf] %vm850_vm5, %v799_v32  ;;  %986 = vst.msk [vmem:[%s2260_s14 + $0x1c] sm:$0xf] %vm850_vm5, %v898_v35 }
 0x182   : > { %v896_v38 = vpop.permute.xlu0 %895  ;;  %v930_v41 = vpop.permute.xlu1 %929 }
 0x183   : > { %985 = vst.msk [vmem:[%s2260_s14 + $0x18] sm:$0xf] %vm850_vm5, %v896_v38  ;;  %1002 = vst.msk [vmem:[%s2260_s14 + $0x5c] sm:$0xf] %vm850_vm5, %v930_v41 }
 0x186   : > { %v928_v43 = vpop.permute.xlu0 %927  ;;  %v765_v57 = vpop.permute.xlu1 %764 }
 0x187   : > { %1001 = vst.msk [vmem:[%s2260_s14 + $0x58] sm:$0xf] %vm850_vm5, %v928_v43  ;;  %856 = vst.msk [vmem:[%s2218_s6 + $0x14] sm:$0xf] %vm850_vm5, %v765_v57 }
 0x18a   : > { %v763_v44 = vpop.permute.xlu0 %762  ;;  %v797_v18 = vpop.permute.xlu1 %796 }
 0x18b   : > { %855 = vst.msk [vmem:[%s2218_s6 + $0x10] sm:$0xf] %vm850_vm5, %v763_v44  ;;  %872 = vst.msk [vmem:[%s2218_s6 + $0x54] sm:$0xf] %vm850_vm5, %v797_v18 }
 0x18e   : > { %v795_v47 = vpop.permute.xlu0 %794  ;;  %v894_v20 = vpop.permute.xlu1 %893 }
 0x18f   : > { %871 = vst.msk [vmem:[%s2218_s6 + $0x50] sm:$0xf] %vm850_vm5, %v795_v47  ;;  %984 = vst.msk [vmem:[%s2260_s14 + $0x14] sm:$0xf] %vm850_vm5, %v894_v20 }
 0x192   : > { %v892_v48 = vpop.permute.xlu0 %891  ;;  %v926_v50 = vpop.permute.xlu1 %925 }
 0x193   : > { %983 = vst.msk [vmem:[%s2260_s14 + $0x10] sm:$0xf] %vm850_vm5, %v892_v48  ;;  %1000 = vst.msk [vmem:[%s2260_s14 + $0x54] sm:$0xf] %vm850_vm5, %v926_v50 }
 0x196   : > { %v924_v54 = vpop.permute.xlu0 %923  ;;  %v777_v55 = vpop.permute.xlu1 %776 }
 0x197   : > { %999 = vst.msk [vmem:[%s2260_s14 + $0x50] sm:$0xf] %vm850_vm5, %v924_v54  ;;  %862 = vst.msk [vmem:[%s2218_s6 + $0x2c] sm:$0xf] %vm850_vm5, %v777_v55 }
 0x19a   : > { %v775_v29 = vpop.permute.xlu0 %774  ;;  %v809_v31 = vpop.permute.xlu1 %808 }
 0x19b   : > { %861 = vst.msk [vmem:[%s2218_s6 + $0x28] sm:$0xf] %vm850_vm5, %v775_v29  ;;  %878 = vst.msk [vmem:[%s2218_s6 + $0x6c] sm:$0xf] %vm850_vm5, %v809_v31 }
 0x19e   : > { %v807_v34 = vpop.permute.xlu0 %806  ;;  %v906_v60 = vpop.permute.xlu1 %905 }
 0x19f   : > { %877 = vst.msk [vmem:[%s2218_s6 + $0x68] sm:$0xf] %vm850_vm5, %v807_v34  ;;  %990 = vst.msk [vmem:[%s2260_s14 + $0x2c] sm:$0xf] %vm850_vm5, %v906_v60 }
 0x1a2   : > { %v904_v36 = vpop.permute.xlu0 %903  ;;  %v938_v63 = vpop.permute.xlu1 %937 }
 0x1a3   : > { %989 = vst.msk [vmem:[%s2260_s14 + $0x28] sm:$0xf] %vm850_vm5, %v904_v36  ;;  %1006 = vst.msk [vmem:[%s2260_s14 + $0x6c] sm:$0xf] %vm850_vm5, %v938_v63 }
 0x1a6   : > { %v936_v7 = vpop.permute.xlu0 %935  ;;  %v773_v61 = vpop.permute.xlu1 %772 }
 0x1a7   : > { %1005 = vst.msk [vmem:[%s2260_s14 + $0x68] sm:$0xf] %vm850_vm5, %v936_v7  ;;  %860 = vst.msk [vmem:[%s2218_s6 + $0x24] sm:$0xf] %vm850_vm5, %v773_v61 }
 0x1aa   : > { %v771_v45 = vpop.permute.xlu0 %770  ;;  %v805_v53 = vpop.permute.xlu1 %804 }
 0x1ab   : > { %859 = vst.msk [vmem:[%s2218_s6 + $0x20] sm:$0xf] %vm850_vm5, %v771_v45  ;;  %876 = vst.msk [vmem:[%s2218_s6 + $0x64] sm:$0xf] %vm850_vm5, %v805_v53 }
 0x1ae   : > { %v803_v1 = vpop.permute.xlu0 %802  ;;  %v902_v15 = vpop.permute.xlu1 %901 }
 0x1af   : > { %875 = vst.msk [vmem:[%s2218_s6 + $0x60] sm:$0xf] %vm850_vm5, %v803_v1  ;;  %988 = vst.msk [vmem:[%s2260_s14 + $0x24] sm:$0xf] %vm850_vm5, %v902_v15 }
 0x1b2   : > { %v900_v56 = vpop.permute.xlu0 %899  ;;  %v934_v8 = vpop.permute.xlu1 %933 }
 0x1b3   : > { %987 = vst.msk [vmem:[%s2260_s14 + $0x20] sm:$0xf] %vm850_vm5, %v900_v56  ;;  %1004 = vst.msk [vmem:[%s2260_s14 + $0x64] sm:$0xf] %vm850_vm5, %v934_v8 }
 0x1b6   : > { %v932_v3 = vpop.permute.xlu0 %931  ;;  %v785_v4 = vpop.permute.xlu1 %784 }
 0x1b7   : > { %1003 = vst.msk [vmem:[%s2260_s14 + $0x60] sm:$0xf] %vm850_vm5, %v932_v3  ;;  %866 = vst.msk [vmem:[%s2218_s6 + $0x3c] sm:$0xf] %vm850_vm5, %v785_v4 }
 0x1ba   : > { %v783_v23 = vpop.permute.xlu0 %782  ;;  %v817_v49 = vpop.permute.xlu1 %816 }
 0x1bb   : > { %865 = vst.msk [vmem:[%s2218_s6 + $0x38] sm:$0xf] %vm850_vm5, %v783_v23  ;;  %882 = vst.msk [vmem:[%s2218_s6 + $0x7c] sm:$0xf] %vm850_vm5, %v817_v49 }
 0x1be   : > { %v815_v5 = vpop.permute.xlu0 %814  ;;  %v914_v10 = vpop.permute.xlu1 %913 }
 0x1bf   : > { %881 = vst.msk [vmem:[%s2218_s6 + $0x78] sm:$0xf] %vm850_vm5, %v815_v5  ;;  %994 = vst.msk [vmem:[%s2260_s14 + $0x3c] sm:$0xf] %vm850_vm5, %v914_v10 }
 0x1c2   : > { %v912_v12 = vpop.permute.xlu0 %911  ;;  %v781_v59 = vpop.permute.xlu1 %780 }
 0x1c3   : > { %993 = vst.msk [vmem:[%s2260_s14 + $0x38] sm:$0xf] %vm850_vm5, %v912_v12  ;;  %864 = vst.msk [vmem:[%s2218_s6 + $0x34] sm:$0xf] %vm850_vm5, %v781_v59 }
 0x1c6   : > { %v779_v26 = vpop.permute.xlu0 %778  ;;  %v813_v13 = vpop.permute.xlu1 %812 }
 0x1c7   : > { %863 = vst.msk [vmem:[%s2218_s6 + $0x30] sm:$0xf] %vm850_vm5, %v779_v26  ;;  %880 = vst.msk [vmem:[%s2218_s6 + $0x74] sm:$0xf] %vm850_vm5, %v813_v13 }
 0x1ca   : > { %v811_v51 = vpop.permute.xlu0 %810 }
 0x1cb   : > { %879 = vst.msk [vmem:[%s2218_s6 + $0x70] sm:$0xf] %vm850_vm5, %v811_v51 }
 0x1cc   : > { %v910_v46 = vpop.permute.xlu1 %909 }
 0x1cd   : > { %992 = vst.msk [vmem:[%s2260_s14 + $0x34] sm:$0xf] %vm850_vm5, %v910_v46 }
 0x1ce   : > { %v908_v24 = vpop.permute.xlu0 %907 }
 0x1cf   : > { %991 = vst.msk [vmem:[%s2260_s14 + $0x30] sm:$0xf] %vm850_vm5, %v908_v24 }
 0x1d0   : > { %v942_v16 = vpop.permute.xlu1 %941 }
 0x1d1   : > { %1008 = vst.msk [vmem:[%s2260_s14 + $0x74] sm:$0xf] %vm850_vm5, %v942_v16 }
 0x1d2   : > { %v940_v19 = vpop.permute.xlu0 %939 }
 0x1d3   : > { %1007 = vst.msk [vmem:[%s2260_s14 + $0x70] sm:$0xf] %vm850_vm5, %v940_v19 }
 0x1d4   : > { %v946_v27 = vpop.permute.xlu1 %945 }
 0x1d5   : > { %1010 = vst.msk [vmem:[%s2260_s14 + $0x7c] sm:$0xf] %vm850_vm5, %v946_v27 }
 0x1d6   : > { %v944_v42 = vpop.permute.xlu0 %943 }
 0x1d7   : > { %1009 = vst.msk [vmem:[%s2260_s14 + $0x78] sm:$0xf] %vm850_vm5, %v944_v42 }
 0x1d8 PF: > { %p1534_p5 = scmp.ge.s32.totalorder %s1645_s21, 2  ;;  %s1262_s9 = sand.u32 1, %s1633_s18  }
 0x1d9   : > { %s1263_s17 = scalar_lea.sflag [#allocation3], %s1262_s9 }
 0x1da   : > { %p1531_p13 = pnand %p1534_p5, %p1719_p6 }
 0x1dc   : > { %p1532_p0 = pneg %p1531_p13 }
 0x1de   : > { %1628 = dma.done.wait (%p1532_p0), %s1263_s17, 32  }
 0x1df   : > { %1630 = vsyncadd (%p1532_p0), %s1263_s17, 4294967264  ;;  %p16_p1 = scmp.ge.s32.totalorder %s1703_s24, 4   ;;  %s2419_s18 = smov %s1637_s19 }
 0x1e0   : > { %s2420_s19 = smov %s1641_s20  ;;  %s2421_s20 = smov %s1713_s27 }
 0x1e1   : > { %s2422_s21 = smov %s1703_s24  ;;  %18 = sbr.rel (!%p16_p1) target bundleno = 3 (0x3), region = 99 }
 0x1e6   :  { %1268 = vsyncpa [#allocation3], 1 }
 0x1e7   :  { %1270 = vsyncpa [#allocation3 + $0x1], 1 }

</bundles_post_ra>
